<compile_context>
chip_gen: v6e
topology: v6e:2x2x1
jax: 0.10.0
libtpu: 0.0.40
codegen_flags: <defaults>
</compile_context>

<pallas_src>
import functools

import jax
import jax.numpy as jnp
from jax import lax
from jax.experimental import pallas as pl
from jax.experimental.pallas import tpu as pltpu

_LANE = 128
_DEFAULT_BLOCK_ROWS = 2048       # (2048, 128) f32 = 1 MiB per input per step

# JaccardLoss(mode='binary', from_logits=True) defaults
_SMOOTH = 0.0
_EPS = 1e-7


def _iw_jaccard_kernel(logit_ref, mask_ref, iw_ref, out_ref,
                       acc_i_ref, acc_c_ref, acc_t_ref,
                       *, smooth, eps, block_rows, total_rows, needs_mask):
    i = pl.program_id(0)

    @pl.when(i == 0)
    def _():
        acc_i_ref[...] = jnp.zeros_like(acc_i_ref)   # sum(p * t * w)
        acc_c_ref[...] = jnp.zeros_like(acc_c_ref)   # sum((p + t) * w)
        acc_t_ref[...] = jnp.zeros_like(acc_t_ref)   # sum(t)  (empty-mask gate)

    # from_logits=True: logsigmoid(x).exp() == sigmoid(x)
    p = jax.nn.sigmoid(logit_ref[...].astype(jnp.float32))
    t = mask_ref[...].astype(jnp.float32)
    w = iw_ref[...].astype(jnp.float32)

    tw = t * w                      # reuse t*w for both terms
    c_inter = p * tw                # output * target * iw
    c_card = p * w + tw             # (output + target) * iw
    c_tsum = t

    if needs_mask:
        # The last grid block overhangs the array; rows past total_rows hold
        # undefined data.  jnp.where zeroes them safely (even if NaN/inf).
        row = i * block_rows + lax.broadcasted_iota(
            jnp.int32, (block_rows, _LANE), 0)
        valid = row < total_rows
        c_inter = jnp.where(valid, c_inter, 0.0)
        c_card = jnp.where(valid, c_card, 0.0)
        c_tsum = jnp.where(valid, c_tsum, 0.0)

    # Lane-wise partial sums: mostly VPU adds, one small sublane reduce per
    # quantity per step.  The 128-wide cross-lane reduce happens once, at the end.
    acc_i_ref[...] += jnp.sum(c_inter, axis=0, keepdims=True)
    acc_c_ref[...] += jnp.sum(c_card, axis=0, keepdims=True)
    acc_t_ref[...] += jnp.sum(c_tsum, axis=0, keepdims=True)

    @pl.when(i == pl.num_programs(0) - 1)
    def _():
        intersection = jnp.sum(acc_i_ref[...])
        cardinality = jnp.sum(acc_c_ref[...])
        tsum = jnp.sum(acc_t_ref[...])
        union = cardinality - intersection
        score = (intersection + smooth) / jnp.maximum(union + smooth, eps)
        loss = 1.0 - score                               # log_loss=False
        # classes=None, single binary class -> .mean() is the value itself
        out_ref[0, 0] = jnp.where(tsum > 0.0, loss, 0.0)


def iw_jaccard_loss(logits, masks, iw, smooth=_SMOOTH, eps=_EPS,
                    block_rows=None):
    """logits, masks, iw: (N, 1, H, W) (any float dtype). Returns scalar f32."""
    assert logits.shape == masks.shape == iw.shape
    n_elem = logits.size
    rem = n_elem % _LANE

    def prep(x):
        x = jnp.reshape(x, (-1,))                 # contiguous reshape: no copy
        if rem:
            # Rare path: <128 zeros so the flat array folds into 128-lane rows.
            # Zero padding is inert here (t == 0 and w == 0).
            x = jnp.pad(x, (0, _LANE - rem))
        return jnp.reshape(x, (-1, _LANE))

    lg, mk, wt = prep(logits), prep(masks), prep(iw)
    rows = lg.shape[0]
    if block_rows is None:
        # Full-array block when small (always legal), else 2048 rows (1 MiB).
        block_rows = rows if rows <= _DEFAULT_BLOCK_ROWS else _DEFAULT_BLOCK_ROWS
    grid = (pl.cdiv(rows, block_rows),)
    needs_mask = (rows % block_rows) != 0

    kernel = functools.partial(
        _iw_jaccard_kernel, smooth=float(smooth), eps=float(eps),
        block_rows=block_rows, total_rows=rows, needs_mask=needs_mask)

    idx = lambda i: (i, 0)
    out = pl.pallas_call(
        kernel,
        out_shape=jax.ShapeDtypeStruct((1, 1), jnp.float32),
        grid_spec=pltpu.PrefetchScalarGridSpec(
            num_scalar_prefetch=0,
            grid=grid,
            in_specs=[
                pl.BlockSpec((block_rows, _LANE), idx),
                pl.BlockSpec((block_rows, _LANE), idx),
                pl.BlockSpec((block_rows, _LANE), idx),
            ],
            out_specs=pl.BlockSpec(memory_space=pltpu.MemorySpace.SMEM),
            scratch_shapes=[
                pltpu.VMEM((1, _LANE), jnp.float32),
                pltpu.VMEM((1, _LANE), jnp.float32),
                pltpu.VMEM((1, _LANE), jnp.float32),
            ],
        ),
        compiler_params=pltpu.CompilerParams(
            dimension_semantics=("arbitrary",)),
        # TODO(synk): optional v7x 2-TC split (leading size-2 "parallel" axis
        # with per-core partial sums) only if one TC can't saturate HBM.
    )(lg, mk, wt)
    return out[0, 0]


def _reference(logits, masks, iw, smooth=_SMOOTH, eps=_EPS):
    p = jax.nn.sigmoid(logits.astype(jnp.float32))
    t = masks.astype(jnp.float32)
    w = iw.astype(jnp.float32)
    inter = jnp.sum(p * t * w)
    card = jnp.sum((p + t) * w)
    union = card - inter
    score = (inter + smooth) / jnp.maximum(union + smooth, eps)
    loss = 1.0 - score
    gate = jnp.where(jnp.sum(t) > 0.0, 1.0, 0.0)
    return loss * gate


if __name__ == "__main__":
    key = jax.random.PRNGKey(0)

    # Test 1: module-shaped small input (Nx1xHxW, binary mode), single block.
    k1, k2, k3, k4, k5, k6 = jax.random.split(key, 6)
    N, C, H, W = 2, 1, 16, 16
    logits = jax.random.normal(k1, (N, C, H, W), dtype=jnp.float32)
    masks = (jax.random.uniform(k2, (N, C, H, W)) > 0.5).astype(jnp.float32)
    iw = jax.random.uniform(k3, (N, C, H, W), dtype=jnp.float32) + 0.5

    loss = jax.block_until_ready(iw_jaccard_loss(logits, masks, iw))
    ref = jax.block_until_ready(_reference(logits, masks, iw))
    assert jnp.allclose(loss, ref, rtol=1e-5, atol=1e-6), (loss, ref)

    # Test 2: odd sizes + small block_rows to exercise lane padding, a multi-step
    # grid, and the partial-last-block row mask.
    N2, C2, H2, W2 = 3, 1, 48, 37
    logits2 = jax.random.normal(k4, (N2, C2, H2, W2), dtype=jnp.float32)
    masks2 = (jax.random.uniform(k5, (N2, C2, H2, W2)) > 0.5).astype(jnp.float32)
    iw2 = jax.random.uniform(k6, (N2, C2, H2, W2), dtype=jnp.float32) + 0.5

    loss2 = jax.block_until_ready(iw_jaccard_loss(logits2, masks2, iw2,
                                                  block_rows=16))
    ref2 = jax.block_until_ready(_reference(logits2, masks2, iw2))
    assert jnp.allclose(loss2, ref2, rtol=1e-5, atol=1e-6), (loss2, ref2)

    print("KERNEL_OK")
</pallas_src>

<mosaic_0001>
module attributes {stable_mosaic.version = 11 : i64} {
  func.func @_iw_jaccard_kernel(%arg0: i32, %arg1: memref<4x128xf32, #tpu.memory_space<vmem>>, %arg2: memref<4x128xf32, #tpu.memory_space<vmem>>, %arg3: memref<4x128xf32, #tpu.memory_space<vmem>>, %arg4: memref<1x1xf32, #tpu.memory_space<smem>>, %arg5: memref<1x128xf32, #tpu.memory_space<vmem>>, %arg6: memref<1x128xf32, #tpu.memory_space<vmem>>, %arg7: memref<1x128xf32, #tpu.memory_space<vmem>>) attributes {dimension_semantics = [#tpu.dimension_semantics<arbitrary>], iteration_bounds = array<i64: 1>, scalar_prefetch = 0 : i64, scratch_operands = 3 : i64, tpu.core_type = #tpu.core_type<tc>, window_params = [{transform_indices = @transform_0, window_bounds = array<i64: 4, 128>}, {transform_indices = @transform_1, window_bounds = array<i64: 4, 128>}, {transform_indices = @transform_2, window_bounds = array<i64: 4, 128>}, {transform_indices = @transform_3, window_bounds = array<i64: 1, 1>}]} {
    %c0_i32 = arith.constant 0 : i32
    %0 = arith.cmpi eq, %arg0, %c0_i32 : i32
    %1 = arith.extui %0 : i1 to i32
    %c0_i32_0 = arith.constant 0 : i32
    %2 = arith.cmpi ne, %1, %c0_i32_0 : i32
    scf.if %2 {
      %cst_23 = arith.constant 0.000000e+00 : f32
      %33 = vector.broadcast %cst_23 : f32 to vector<1x128xf32>
      %c0_24 = arith.constant 0 : index
      %c0_25 = arith.constant 0 : index
      %34 = vector.load %arg5[%c0_24, %c0_25] : memref<1x128xf32, #tpu.memory_space<vmem>>, vector<1x128xf32>
      tpu.vector_store %arg5[%c0_24, %c0_25], %33 {strides = array<i32>} : memref<1x128xf32, #tpu.memory_space<vmem>>, vector<1x128xf32>,
      %cst_26 = arith.constant 0.000000e+00 : f32
      %35 = vector.broadcast %cst_26 : f32 to vector<1x128xf32>
      %c0_27 = arith.constant 0 : index
      %c0_28 = arith.constant 0 : index
      %36 = vector.load %arg6[%c0_27, %c0_28] : memref<1x128xf32, #tpu.memory_space<vmem>>, vector<1x128xf32>
      tpu.vector_store %arg6[%c0_27, %c0_28], %35 {strides = array<i32>} : memref<1x128xf32, #tpu.memory_space<vmem>>, vector<1x128xf32>,
      %cst_29 = arith.constant 0.000000e+00 : f32
      %37 = vector.broadcast %cst_29 : f32 to vector<1x128xf32>
      %c0_30 = arith.constant 0 : index
      %c0_31 = arith.constant 0 : index
      %38 = vector.load %arg7[%c0_30, %c0_31] : memref<1x128xf32, #tpu.memory_space<vmem>>, vector<1x128xf32>
      tpu.vector_store %arg7[%c0_30, %c0_31], %37 {strides = array<i32>} : memref<1x128xf32, #tpu.memory_space<vmem>>, vector<1x128xf32>,
    } else {
    }
    %c0 = arith.constant 0 : index
    %c0_1 = arith.constant 0 : index
    %3 = vector.load %arg1[%c0, %c0_1] : memref<4x128xf32, #tpu.memory_space<vmem>>, vector<4x128xf32>
    %4 = arith.negf %3 : vector<4x128xf32>
    %5 = math.exp %4 : vector<4x128xf32>
    %cst = arith.constant 1.000000e+00 : f32
    %6 = vector.broadcast %cst : f32 to vector<4x128xf32>
    %7 = arith.addf %6, %5 : vector<4x128xf32>
    %8 = arith.divf %6, %7 : vector<4x128xf32>
    %c0_2 = arith.constant 0 : index
    %c0_3 = arith.constant 0 : index
    %9 = vector.load %arg2[%c0_2, %c0_3] : memref<4x128xf32, #tpu.memory_space<vmem>>, vector<4x128xf32>
    %c0_4 = arith.constant 0 : index
    %c0_5 = arith.constant 0 : index
    %10 = vector.load %arg3[%c0_4, %c0_5] : memref<4x128xf32, #tpu.memory_space<vmem>>, vector<4x128xf32>
    %11 = arith.mulf %9, %10 : vector<4x128xf32>
    %12 = arith.mulf %8, %11 : vector<4x128xf32>
    %13 = arith.mulf %8, %10 : vector<4x128xf32>
    %14 = arith.addf %13, %11 : vector<4x128xf32>
    %c0_6 = arith.constant 0 : index
    %c0_7 = arith.constant 0 : index
    %15 = vector.load %arg5[%c0_6, %c0_7] : memref<1x128xf32, #tpu.memory_space<vmem>>, vector<1x128xf32>
    %cst_8 = arith.constant dense<0.000000e+00> : vector<128xf32>
    %16 = vector.multi_reduction <add>, %12, %cst_8 [0] : vector<4x128xf32> to vector<128xf32>
    %17 = vector.shape_cast %16 : vector<128xf32> to vector<1x128xf32>
    %18 = arith.addf %15, %17 : vector<1x128xf32>
    %c0_9 = arith.constant 0 : index
    %c0_10 = arith.constant 0 : index
    %19 = vector.load %arg5[%c0_9, %c0_10] : memref<1x128xf32, #tpu.memory_space<vmem>>, vector<1x128xf32>
    tpu.vector_store %arg5[%c0_9, %c0_10], %18 {strides = array<i32>} : memref<1x128xf32, #tpu.memory_space<vmem>>, vector<1x128xf32>,
    %c0_11 = arith.constant 0 : index
    %c0_12 = arith.constant 0 : index
    %20 = vector.load %arg6[%c0_11, %c0_12] : memref<1x128xf32, #tpu.memory_space<vmem>>, vector<1x128xf32>
    %cst_13 = arith.constant dense<0.000000e+00> : vector<128xf32>
    %21 = vector.multi_reduction <add>, %14, %cst_13 [0] : vector<4x128xf32> to vector<128xf32>
    %22 = vector.shape_cast %21 : vector<128xf32> to vector<1x128xf32>
    %23 = arith.addf %20, %22 : vector<1x128xf32>
    %c0_14 = arith.constant 0 : index
    %c0_15 = arith.constant 0 : index
    %24 = vector.load %arg6[%c0_14, %c0_15] : memref<1x128xf32, #tpu.memory_space<vmem>>, vector<1x128xf32>
    tpu.vector_store %arg6[%c0_14, %c0_15], %23 {strides = array<i32>} : memref<1x128xf32, #tpu.memory_space<vmem>>, vector<1x128xf32>,
    %c0_16 = arith.constant 0 : index
    %c0_17 = arith.constant 0 : index
    %25 = vector.load %arg7[%c0_16, %c0_17] : memref<1x128xf32, #tpu.memory_space<vmem>>, vector<1x128xf32>
    %cst_18 = arith.constant dense<0.000000e+00> : vector<128xf32>
    %26 = vector.multi_reduction <add>, %9, %cst_18 [0] : vector<4x128xf32> to vector<128xf32>
    %27 = vector.shape_cast %26 : vector<128xf32> to vector<1x128xf32>
    %28 = arith.addf %25, %27 : vector<1x128xf32>
    %c0_19 = arith.constant 0 : index
    %c0_20 = arith.constant 0 : index
    %29 = vector.load %arg7[%c0_19, %c0_20] : memref<1x128xf32, #tpu.memory_space<vmem>>, vector<1x128xf32>
    tpu.vector_store %arg7[%c0_19, %c0_20], %28 {strides = array<i32>} : memref<1x128xf32, #tpu.memory_space<vmem>>, vector<1x128xf32>,
    %c0_i32_21 = arith.constant 0 : i32
    %30 = arith.cmpi eq, %arg0, %c0_i32_21 : i32
    %31 = arith.extui %30 : i1 to i32
    %c0_i32_22 = arith.constant 0 : i32
    %32 = arith.cmpi ne, %31, %c0_i32_22 : i32
    scf.if %32 {
      %c0_23 = arith.constant 0 : index
      %c0_24 = arith.constant 0 : index
      %33 = vector.load %arg5[%c0_23, %c0_24] : memref<1x128xf32, #tpu.memory_space<vmem>>, vector<1x128xf32>
      %34 = vector.shape_cast %33 : vector<1x128xf32> to vector<1x1x128xf32>
      %cst_25 = arith.constant dense<0.000000e+00> : vector<1xf32>
      %35 = vector.multi_reduction <add>, %34, %cst_25 [1, 2] : vector<1x1x128xf32> to vector<1xf32>
      %36 = vector.shape_cast %35 : vector<1xf32> to vector<1x1x1xf32>
      %37 = vector.extract %36[0, 0, 0] : f32 from vector<1x1x1xf32>
      %c0_26 = arith.constant 0 : index
      %c0_27 = arith.constant 0 : index
      %38 = vector.load %arg6[%c0_26, %c0_27] : memref<1x128xf32, #tpu.memory_space<vmem>>, vector<1x128xf32>
      %39 = vector.shape_cast %38 : vector<1x128xf32> to vector<1x1x128xf32>
      %cst_28 = arith.constant dense<0.000000e+00> : vector<1xf32>
      %40 = vector.multi_reduction <add>, %39, %cst_28 [1, 2] : vector<1x1x128xf32> to vector<1xf32>
      %41 = vector.shape_cast %40 : vector<1xf32> to vector<1x1x1xf32>
      %42 = vector.extract %41[0, 0, 0] : f32 from vector<1x1x1xf32>
      %c0_29 = arith.constant 0 : index
      %c0_30 = arith.constant 0 : index
      %43 = vector.load %arg7[%c0_29, %c0_30] : memref<1x128xf32, #tpu.memory_space<vmem>>, vector<1x128xf32>
      %44 = vector.shape_cast %43 : vector<1x128xf32> to vector<1x1x128xf32>
      %cst_31 = arith.constant dense<0.000000e+00> : vector<1xf32>
      %45 = vector.multi_reduction <add>, %44, %cst_31 [1, 2] : vector<1x1x128xf32> to vector<1xf32>
      %46 = vector.shape_cast %45 : vector<1xf32> to vector<1x1x1xf32>
      %47 = vector.extract %46[0, 0, 0] : f32 from vector<1x1x1xf32>
      %48 = arith.subf %42, %37 : f32
      %cst_32 = arith.constant 0.000000e+00 : f32
      %49 = arith.addf %37, %cst_32 : f32
      %cst_33 = arith.constant 0.000000e+00 : f32
      %50 = arith.addf %48, %cst_33 : f32
      %cst_34 = arith.constant 1.000000e-07 : f32
      %51 = arith.maximumf %50, %cst_34 : f32
      %52 = arith.divf %49, %51 : f32
      %cst_35 = arith.constant 1.000000e+00 : f32
      %53 = arith.subf %cst_35, %52 : f32
      %cst_36 = arith.constant 0.000000e+00 : f32
      %54 = arith.cmpf ogt, %47, %cst_36 : f32
      %cst_37 = arith.constant 0.000000e+00 : f32
      %55 = arith.select %54, %53, %cst_37 : f32
      %c0_38 = arith.constant 0 : index
      %c0_39 = arith.constant 0 : index
      %56 = memref.load %arg4[%c0_38, %c0_39] : memref<1x1xf32, #tpu.memory_space<smem>>
      memref.store %55, %arg4[%c0_38, %c0_39] : memref<1x1xf32, #tpu.memory_space<smem>>
    } else {
    }
    return
  }
  func.func @transform_0(%arg0: i32) -> (i32, i32) {
    %c0_i32 = arith.constant 0 : i32
    %c0_i32_0 = arith.constant 0 : i32
    return %arg0, %c0_i32 : i32, i32
  }
  func.func @transform_1(%arg0: i32) -> (i32, i32) {
    %c0_i32 = arith.constant 0 : i32
    %c0_i32_0 = arith.constant 0 : i32
    return %arg0, %c0_i32 : i32, i32
  }
  func.func @transform_2(%arg0: i32) -> (i32, i32) {
    %c0_i32 = arith.constant 0 : i32
    %c0_i32_0 = arith.constant 0 : i32
    return %arg0, %c0_i32 : i32, i32
  }
  func.func @transform_3(%arg0: i32) -> (i32, i32) {
    %c0_i32 = arith.constant 0 : i32
    %c0_i32_0 = arith.constant 0 : i32
    %c0_i32_1 = arith.constant 0 : i32
    return %c0_i32, %c0_i32_0 : i32, i32
  }
}

</mosaic_0001>

<bundles_post_ra>
// kernel: tpu_custom_call.1
= control target key start
LH: loop header
LB: loop body
LE: loop exit
PB: predicated region body
PF: predicated region fallthrough
CT: control target
= control target key end

     0   :  { %8 = vsyncpa [#allocation6], 0  ;;  %s305_s0 = inlined_call_operand.hbm [shape: f32[4,128], index: 0, kind: input, shape index: {}]   ;;  %s306_s1 = inlined_call_operand.hbm [shape: f32[4,128], index: 1, kind: input, shape index: {}]   ;;  %s307_s2 = inlined_call_operand.hbm [shape: f32[4,128], index: 2, kind: input, shape index: {}]   ;;  %s308_s3 = inlined_call_operand.hbm [shape: f32[1,1], index: 3, kind: output, shape index: {}]  }
   0x1   :  { %9 = vsyncpa [#allocation9], 0 }
   0x2   :  { %10 = vsyncpa [#allocation7], 0  ;;  %s261_s12 = smov [#allocation8]   ;;  %s262_s14 = smov [#allocation5]  }
   0x3   :  { %s27_s13 = sshll.u32 %s261_s12, 4  ;;  %s17_s15 = sshll.u32 %s262_s14, 4  ;;  %s28_s13 = int_to_ptr.vmem [resolvable:$true] %s27_s13  ;;  %s18_s15 = int_to_ptr.vmem [resolvable:$true] %s17_s15 }
   0x4   :  { %s195_s16 = scalar_lea.vmem %s28_s13, 64  ;;  %p200_p1 = scmp.lt.s32.totalorder %s28_s13, %s28_s13 }
   0x5   :  { %p196_p0 = scmp.ne.s32.totalorder %s28_s13, %s195_s16  ;;  %p201_p2 = scmp.lt.s32.totalorder %s195_s16, %s195_s16 }
   0x7   :  { %p202_p3 = por %p201_p2, %p200_p1 }
   0x9   :  { %p203_p4 = pnand %p202_p3, %p196_p0 }
   0xb   :  { %206 = shalt.err (!%p203_p4)
}
   0xc   :  { %30 = dma.hbm_to_vmem [thread:$0]  %s306_s1, 64, %s28_s13, [#allocation9]  }
   0xd   :  { %s215_s19 = scalar_lea.vmem %s18_s15, 64  ;;  %p220_p6 = scmp.lt.s32.totalorder %s18_s15, %s18_s15 }
   0xe   :  { %p216_p5 = scmp.ne.s32.totalorder %s18_s15, %s215_s19  ;;  %p221_p7 = scmp.lt.s32.totalorder %s215_s19, %s215_s19 }
  0x10   :  { %p222_p8 = por %p221_p7, %p220_p6 }
  0x12   :  { %p223_p9 = pnand %p222_p8, %p216_p5 }
  0x14   :  { %226 = shalt.err (!%p223_p9)
}
  0x15   :  { %20 = dma.hbm_to_vmem [thread:$0]  %s305_s0, 64, %s18_s15, [#allocation6]  }
  0x16   :  { %s263_s22 = smov [#allocation10]  }
  0x17   :  { %s37_s23 = sshll.u32 %s263_s22, 4  ;;  %s38_s23 = int_to_ptr.vmem [resolvable:$true] %s37_s23 }
  0x18   :  { %s235_s24 = scalar_lea.vmem %s38_s23, 64  ;;  %p240_p11 = scmp.lt.s32.totalorder %s38_s23, %s38_s23 }
  0x19   :  { %p236_p10 = scmp.ne.s32.totalorder %s38_s23, %s235_s24  ;;  %p241_p12 = scmp.lt.s32.totalorder %s235_s24, %s235_s24 }
  0x1b   :  { %p242_p13 = por %p241_p12, %p240_p11 }
  0x1d   :  { %p243_p0 = pnand %p242_p13, %p236_p10 }
  0x1f   :  { %246 = shalt.err (!%p243_p0)
}
  0x20   :  { %40 = dma.hbm_to_vmem [thread:$0]  %s307_s2, 64, %s38_s23, [#allocation9]  }
  0x21   :  { %255 = dma.done.wait [#allocation6], 64  }
  0x22   :  { %256 = vsyncadd [#allocation6], 4294967232 }
  0x23   :  { %257 = dma.done.wait [#allocation9], 128  }
  0x24   :  { %258 = vsyncadd [#allocation9], 4294967168  ;;  %v264_v0 = vmov 0.0   ;;  %v57_v1 = vld [vmem:[#allocation5] sm:$0xf]  ;;  %vm71_vm0 = vcmask 1043456  }
  0x25   :  { %54 = vst [vmem:[#allocation2] sm:$0x1] %v264_v0  ;;  %55 = vst [vmem:[#allocation3] sm:$0x1] %v264_v0  ;;  %v166_v2 = vmul.f32 -1.442695, %v57_v1 }
  0x26   :  { %56 = vst [vmem:[#allocation4] sm:$0x1] %v264_v0  ;;  %v64_v3 = vld [vmem:[#allocation8] sm:$0xf]  ;;  %vm105_vm1 = vcmask 1040384   ;;  %s266_s6 = smov [#allocation11]  }
  0x27   :  { %v92_v4 = vsel %vm71_vm0, %v64_v3, 0.0  ;;  %181 = vpow2.f32 %v166_v2  ;;  %v65_v17 = vld [vmem:[#allocation10] sm:$0xf]  ;;  %s265_s27 = smov 1e-07  }
  0x28   :  { %v93_v5 = vrot.slane %v92_v4, 4  ;;  %v66_v18 = vmul.f32 %v65_v17, %v64_v3 }
  0x2a   :  { %v94_v6 = vadd.f32 %v93_v5, %v92_v4 }
  0x2c   :  { %v95_v7 = vrot.slane %v94_v6, 2  ;;  %v70_v34 = vld [vmem:[#allocation2] sm:$0x1]  ;;  %v81_v37 = vld [vmem:[#allocation3] sm:$0x1] }
  0x2d   :  { %v91_v10 = vld [vmem:[#allocation4] sm:$0x1] }
  0x2e   :  { %v96_v8 = vadd.f32 %v95_v7, %v94_v6 }
  0x30   :  { %v97_v9 = vrot.slane %v96_v8, 1 }
  0x32   :  { %v98_v11 = vadd.f32 %v97_v9, %v96_v8 }
  0x34   :  { %v99_v12 = vadd.f32 %v98_v11, %v91_v10  ;;  %v182_v13 = vpop.eup %181 }
  0x35   :  { %v61_v14 = vadd.f32 1.0, %v182_v13 }
  0x36   :  { %100 = vst [vmem:[#allocation4] sm:$0x1] %v99_v12 }
  0x37   :  { %183 = vrcp.f32 %v61_v14 }
  0x3d   :  { %v127_v15 = vld [vmem:[#allocation4] sm:$0x1] }
  0x3e   :  { %v128_v16 = vsel %vm105_vm1, %v127_v15, 0.0 }
  0x3f   :  { %129 = vadd.xlane.f32.xlu1 %v128_v16 }
  0x44   :  { %v184_v19 = vpop.eup %183 }
  0x45   :  { %v67_v20 = vmul.f32 %v184_v19, %v66_v18  ;;  %v68_v21 = vmul.f32 %v184_v19, %v65_v17 }
  0x47   :  { %v72_v22 = vsel %vm71_vm0, %v67_v20, 0.0  ;;  %v69_v23 = vadd.f32 %v68_v21, %v66_v18 }
  0x48   :  { %v73_v24 = vrot.slane %v72_v22, 4 }
  0x49   :  { %v82_v25 = vsel %vm71_vm0, %v69_v23, 0.0 }
  0x4a   :  { %v74_v26 = vadd.f32 %v73_v24, %v72_v22  ;;  %v83_v27 = vrot.slane %v82_v25, 4 }
  0x4c   :  { %v75_v28 = vrot.slane %v74_v26, 2  ;;  %v84_v29 = vadd.f32 %v83_v27, %v82_v25 }
  0x4e   :  { %v76_v30 = vadd.f32 %v75_v28, %v74_v26  ;;  %v85_v31 = vrot.slane %v84_v29, 2 }
  0x50   :  { %v77_v32 = vrot.slane %v76_v30, 1  ;;  %v86_v33 = vadd.f32 %v85_v31, %v84_v29 }
  0x52   :  { %v78_v35 = vadd.f32 %v77_v32, %v76_v30  ;;  %v87_v36 = vrot.slane %v86_v33, 1 }
  0x54   :  { %v79_v38 = vadd.f32 %v78_v35, %v70_v34  ;;  %v88_v39 = vadd.f32 %v87_v36, %v86_v33 }
  0x56   :  { %80 = vst [vmem:[#allocation2] sm:$0x1] %v79_v38  ;;  %v89_v40 = vadd.f32 %v88_v39, %v81_v37 }
  0x58   :  { %90 = vst [vmem:[#allocation3] sm:$0x1] %v89_v40 }
  0x5d   :  { %v104_v41 = vld [vmem:[#allocation2] sm:$0x1] }
  0x5e   :  { %v106_v42 = vsel %vm105_vm1, %v104_v41, 0.0 }
  0x5f   :  { %107 = vadd.xlane.f32.xlu0 %v106_v42  ;;  %v116_v43 = vld [vmem:[#allocation3] sm:$0x1] }
  0x60   :  { %v117_v44 = vsel %vm105_vm1, %v116_v43, 0.0 }
  0x63   :  { %118 = vadd.xlane.f32.xlu0 %v117_v44 }
  0xc8   :  { %v130_v45 = vpop.xlane.xlu1 %129 }
  0xc9   :  { %v131_v46 = vrot.slane %v130_v45, 4 }
  0xcb   :  { %v132_v47 = vadd.f32 %v131_v46, %v130_v45 }
  0xcd   :  { %v133_v50 = vrot.slane %v132_v47, 2 }
  0xcf   :  { %v134_v55 = vadd.f32 %v133_v50, %v132_v47 }
  0xd1   :  { %v135_v60 = vrot.slane %v134_v55, 1 }
  0xd3   :  { %v136_v0 = vadd.f32 %v135_v60, %v134_v55 }
  0xe8   :  { %v108_v48 = vpop.xlane.xlu0 %107 }
  0xe9   :  { %v109_v49 = vrot.slane %v108_v48, 4 }
  0xeb   :  { %v110_v51 = vadd.f32 %v109_v49, %v108_v48 }
  0xec   :  { %v119_v52 = vpop.xlane.xlu0 %118 }
  0xed   :  { %v111_v53 = vrot.slane %v110_v51, 2  ;;  %v120_v54 = vrot.slane %v119_v52, 4 }
  0xef   :  { %v121_v56 = vadd.f32 %v120_v54, %v119_v52  ;;  %v112_v57 = vadd.f32 %v111_v53, %v110_v51 }
  0xf1   :  { %v122_v58 = vrot.slane %v121_v56, 2  ;;  %v113_v59 = vrot.slane %v112_v57, 1 }
  0xf3   :  { %v123_v61 = vadd.f32 %v122_v58, %v121_v56  ;;  %v114_v62 = vadd.f32 %v113_v59, %v112_v57 }
  0xf5   :  { %167 = vpush %v114_v62  ;;  %v124_v63 = vrot.slane %v123_v61, 1 }
  0xf7   :  { %v125_v1 = vadd.f32 %v124_v63, %v123_v61 }
  0xf9   :  { %169 = vpush %v125_v1 }
  0xfa   :  { %171 = vpush %v136_v0 }
 0x126   :  { %s168_s0 = spop %167 }
 0x12a   :  { %s170_s2 = spop %169 }
 0x12b   :  { %s138_s26 = ssub.f32 %s170_s2, %s168_s0  ;;  %s172_s29 = spop %171 }
 0x12c   :  { %p147_p1 = scmp.gt.f32.partialorder %s172_s29, 0.0 }
 0x12d   :  { %s141_s28 = smax.f32 %s265_s27, %s138_s26 }
 0x12e   :  { %v142_v2 = vstv %s141_s28 }
 0x12f   :  { %185 = vrcp.f32 %v142_v2 }
 0x13c   :  { %v186_v3 = vpop.eup %185 }
 0x13d   :  { %173 = vpush %v186_v3 }
 0x16e   :  { %s174_s30 = spop %173 }
 0x16f   :  { %s145_s4 = smul.f32 %s174_s30, %s168_s0 }
 0x171   :  { %s146_s5 = ssub.f32 1.0, %s145_s4 }
 0x173   :  { %s310_s5 = smov (!%p147_p1, %s146_s5), 0.0 }
 0x174   :  { %150 = sst [smem:[#allocation11]] %s310_s5 }
 0x175   :  { %158 = dma.smem_to_hbm %s266_s6, 16, %s308_s3, [#allocation7]  }
 0x176   :  { %259 = dma.done.wait [#allocation7], 16  }
 0x177   :  { %260 = vsyncadd [#allocation7], 4294967280 }
 0x178   :  { %162 = sfence }
 0x179   :  { %163 = vsyncpa [#allocation6], 1 }
 0x17a   :  { %164 = vsyncpa [#allocation9], 1 }
 0x17b   :  { %165 = vsyncpa [#allocation7], 1 }

</bundles_post_ra>
